<compile_context>
chip_gen: v5e
topology: v5e:2x2
jax: 0.10.0
libtpu: 0.0.40
codegen_flags: <defaults>
</compile_context>

<pallas_src>
import jax
import jax.numpy as jnp
from jax.experimental import pallas as pl
from jax.experimental.pallas import tpu as pltpu


def _make_divisible(v, divisor, min_value=None):
    if min_value is None:
        min_value = divisor
    new_v = max(min_value, int(v + divisor / 2) // divisor * divisor)
    if new_v < 0.9 * v:
        new_v += divisor
    return new_v


# ---------------------------------------------------------------------------
# Tile selection: lane-dense blocks of ~4 MiB (bigger tiles -> closer to the
# HBM roofline), legal under the (8,128) rule (or full-dim), small enough that
# double-buffered in + out + gate stays well under a 32 MiB scoped-VMEM limit
# on every generation (v5e/v6e 128 MiB phys, v7x 64 MiB phys).
# ---------------------------------------------------------------------------
def _pick_tiles(nc, hw, dtype_bytes, target_block_bytes=4 * 1024 * 1024):
    # Lane (last) axis: whole HW when it fits, else a large multiple of 128.
    max_lanes = max(128, (target_block_bytes // (8 * dtype_bytes)) // 128 * 128)
    hw_tile = hw if hw <= max_lanes else max_lanes          # == HW or %128 == 0
    # Sublane (row) axis: fill the block budget, multiple of 8 (or full dim).
    rows_budget = max(8, target_block_bytes // max(1, hw_tile * dtype_bytes))
    rows_budget = max(8, (rows_budget // 8) * 8)
    row_tile = nc if nc <= rows_budget else rows_budget     # == NC or %8 == 0
    return row_tile, hw_tile


# ---------------------------------------------------------------------------
# Phase 1a: global average pool (as a streaming sum; the mean factor is folded
# into the gate kernel).  Output (N*C, 1) f32 accumulated across the HW grid
# axis (resident output block acts as the accumulator).
# ---------------------------------------------------------------------------
def _make_pool_kernel(hw, hw_tile):
    need_mask = (hw % hw_tile) != 0  # static: mask tail lanes only if needed

    def kernel(x_ref, sum_ref):
        h = pl.program_id(1)

        @pl.when(h == 0)
        def _():
            sum_ref[...] = jnp.zeros_like(sum_ref)

        x = x_ref[...].astype(jnp.float32)
        if need_mask:
            lane = jax.lax.broadcasted_iota(jnp.int32, x.shape, 1)
            x = jnp.where(h * hw_tile + lane < hw, x, 0.0)
        sum_ref[...] += jnp.sum(x, axis=-1, keepdims=True)

    return kernel


# ---------------------------------------------------------------------------
# Phase 1b: gate math, one tiny grid step, all batches at once, f32.
# Weights arrive pre-transposed: wr_t = (C, Cr), we_t = (Cr, C).
# ---------------------------------------------------------------------------
def _make_gate_kernel(inv_hw):
    def kernel(ps_ref, wr_ref, br_ref, we_ref, be_ref, g_ref):
        pooled = ps_ref[...] * inv_hw                                   # (N, C) mean
        h = jnp.dot(pooled, wr_ref[...], preferred_element_type=jnp.float32)
        h = jnp.maximum(h + br_ref[...], 0.0)                           # ReLU
        g = jnp.dot(h, we_ref[...], preferred_element_type=jnp.float32)
        g = g + be_ref[...]
        g_ref[...] = jnp.clip(g + 3.0, 0.0, 6.0) * (1.0 / 6.0)          # hard_sigmoid
    return kernel


# ---------------------------------------------------------------------------
# Phase 2: streaming scale out = x * g, native dtype, lane-dense tiles.
# ---------------------------------------------------------------------------
def _scale_kernel(x_ref, g_ref, o_ref):
    o_ref[...] = (x_ref[...] * g_ref[...]).astype(o_ref.dtype)


def squeeze_excite_pallas(x_nchw, w_reduce, b_reduce, w_expand, b_expand):
    N, C, H, W = x_nchw.shape
    HW = H * W
    NC = N * C
    Cr = w_reduce.shape[0]
    dtype = x_nchw.dtype

    # No activation cast: stream x in its native dtype, lane-dense over HW.
    x2d = x_nchw.reshape(NC, HW)

    # Pre-transpose weights in the wrapper (no per-step in-kernel .T).
    wr_t = jnp.transpose(w_reduce).astype(jnp.float32)   # (C, Cr)
    we_t = jnp.transpose(w_expand).astype(jnp.float32)   # (Cr, C)
    br2 = b_reduce.reshape(1, Cr).astype(jnp.float32)
    be2 = b_expand.reshape(1, C).astype(jnp.float32)

    row_tile, hw_tile = _pick_tiles(NC, HW, jnp.dtype(dtype).itemsize)
    grid = (pl.cdiv(NC, row_tile), pl.cdiv(HW, hw_tile))
    vmem_limit = 32 * 1024 * 1024  # safe on v5e/v6e/v7x with ~4 MiB blocks

    # -------- Phase 1a: pooled spatial sums (f32) --------
    pooled_sum = pl.pallas_call(
        _make_pool_kernel(HW, hw_tile),
        out_shape=jax.ShapeDtypeStruct((NC, 1), jnp.float32),
        grid_spec=pltpu.PrefetchScalarGridSpec(
            num_scalar_prefetch=0,
            grid=grid,
            in_specs=[pl.BlockSpec((row_tile, hw_tile), lambda r, h: (r, h))],
            out_specs=pl.BlockSpec((row_tile, 1), lambda r, h: (r, 0)),
        ),
        compiler_params=pltpu.CompilerParams(
            dimension_semantics=("parallel", "arbitrary"),
            vmem_limit_bytes=vmem_limit),
    )(x2d)

    pooled = pooled_sum.reshape(N, C)  # still un-normalized sums (f32)

    # -------- Phase 1b: batched gate math (single tiny grid step) --------
    g = pl.pallas_call(
        _make_gate_kernel(1.0 / HW),
        out_shape=jax.ShapeDtypeStruct((N, C), jnp.float32),
        grid_spec=pltpu.PrefetchScalarGridSpec(
            num_scalar_prefetch=0,
            grid=(1,),
            in_specs=[
                pl.BlockSpec((N, C), lambda i: (0, 0)),
                pl.BlockSpec((C, Cr), lambda i: (0, 0)),
                pl.BlockSpec((1, Cr), lambda i: (0, 0)),
                pl.BlockSpec((Cr, C), lambda i: (0, 0)),
                pl.BlockSpec((1, C), lambda i: (0, 0)),
            ],
            out_specs=pl.BlockSpec((N, C), lambda i: (0, 0)),
        ),
        compiler_params=pltpu.CompilerParams(
            dimension_semantics=("arbitrary",),
            vmem_limit_bytes=vmem_limit),
    )(pooled, wr_t, br2, we_t, be2)

    g_col = g.reshape(NC, 1)  # per-(n,c) gate, broadcast over lanes in-kernel

    # -------- Phase 2: streaming out = x * g --------
    # Note: input_output_aliases={0: 0} would reuse x's HBM buffer, but x here
    # is a non-donated caller array (XLA would insert a copy), so it is omitted.
    out2d = pl.pallas_call(
        _scale_kernel,
        out_shape=jax.ShapeDtypeStruct((NC, HW), dtype),
        grid_spec=pltpu.PrefetchScalarGridSpec(
            num_scalar_prefetch=0,
            grid=grid,
            in_specs=[
                pl.BlockSpec((row_tile, hw_tile), lambda r, h: (r, h)),
                pl.BlockSpec((row_tile, 1), lambda r, h: (r, 0)),
            ],
            out_specs=pl.BlockSpec((row_tile, hw_tile), lambda r, h: (r, h)),
        ),
        compiler_params=pltpu.CompilerParams(
            dimension_semantics=("parallel", "parallel"),
            vmem_limit_bytes=vmem_limit),
    )(x2d, g_col)

    return out2d.reshape(N, C, H, W)


def squeeze_excite_ref(x_nchw, w_reduce, b_reduce, w_expand, b_expand):
    # Pure-JAX reference for validation
    pooled = jnp.mean(x_nchw.astype(jnp.float32), axis=(2, 3))   # (N, C)
    h = pooled @ w_reduce.T + b_reduce                           # (N, Cr)
    h = jnp.maximum(h, 0.0)
    g = h @ w_expand.T + b_expand                                # (N, C)
    g = jnp.clip(g + 3.0, 0.0, 6.0) / 6.0
    return (x_nchw * g[:, :, None, None].astype(x_nchw.dtype)).astype(x_nchw.dtype)


if __name__ == "__main__":
    # Module configuration implied by SqueezeExcite(in_chs=4)
    in_chs = 4
    se_ratio = 0.25
    divisor = 4
    reduced_chs = _make_divisible(in_chs * se_ratio, divisor)    # -> 4

    N, C, H, W = 2, in_chs, 16, 16

    key = jax.random.PRNGKey(0)
    kx, kwr, kbr, kwe, kbe = jax.random.split(key, 5)
    x = jax.random.normal(kx, (N, C, H, W), dtype=jnp.float32)
    # conv_reduce: Conv2d(in_chs, reduced_chs, 1, bias=True) -> weight (Cr, C)
    w_reduce = jax.random.normal(kwr, (reduced_chs, in_chs), dtype=jnp.float32) * 0.1
    b_reduce = jax.random.normal(kbr, (reduced_chs,), dtype=jnp.float32) * 0.1
    # conv_expand: Conv2d(reduced_chs, in_chs, 1, bias=True) -> weight (C, Cr)
    w_expand = jax.random.normal(kwe, (in_chs, reduced_chs), dtype=jnp.float32) * 0.1
    b_expand = jax.random.normal(kbe, (in_chs,), dtype=jnp.float32) * 0.1

    out = squeeze_excite_pallas(x, w_reduce, b_reduce, w_expand, b_expand)
    out = jax.block_until_ready(out)

    ref = squeeze_excite_ref(x, w_reduce, b_reduce, w_expand, b_expand)
    assert out.shape == (N, C, H, W)
    assert jnp.allclose(out, ref, atol=1e-5, rtol=1e-5), "mismatch vs reference"

    print("KERNEL_OK")
</pallas_src>

<mosaic_0001>
module attributes {stable_mosaic.version = 11 : i64} {
  func.func @kernel(%arg0: i32, %arg1: i32, %arg2: memref<8x256xf32, #tpu.memory_space<vmem>>, %arg3: memref<8x1xf32, #tpu.memory_space<vmem>>) attributes {dimension_semantics = [#tpu.dimension_semantics<parallel>, #tpu.dimension_semantics<arbitrary>], iteration_bounds = array<i64: 1, 1>, scalar_prefetch = 0 : i64, scratch_operands = 0 : i64, tpu.core_type = #tpu.core_type<tc>, window_params = [{transform_indices = @transform_0, window_bounds = array<i64: 8, 256>}, {transform_indices = @transform_1, window_bounds = array<i64: 8, 1>}]} {
    %c0_i32 = arith.constant 0 : i32
    %0 = arith.cmpi eq, %arg1, %c0_i32 : i32
    %1 = arith.extui %0 : i1 to i32
    %c0_i32_0 = arith.constant 0 : i32
    %2 = arith.cmpi ne, %1, %c0_i32_0 : i32
    scf.if %2 {
      %cst_6 = arith.constant 0.000000e+00 : f32
      %9 = vector.broadcast %cst_6 : f32 to vector<8x1xf32>
      %c0_7 = arith.constant 0 : index
      %c0_8 = arith.constant 0 : index
      %10 = vector.load %arg3[%c0_7, %c0_8] : memref<8x1xf32, #tpu.memory_space<vmem>>, vector<8x1xf32>
      tpu.vector_store %arg3[%c0_7, %c0_8], %9 {strides = array<i32>} : memref<8x1xf32, #tpu.memory_space<vmem>>, vector<8x1xf32>,
    } else {
    }
    %c0 = arith.constant 0 : index
    %c0_1 = arith.constant 0 : index
    %3 = vector.load %arg2[%c0, %c0_1] : memref<8x256xf32, #tpu.memory_space<vmem>>, vector<8x256xf32>
    %c0_2 = arith.constant 0 : index
    %c0_3 = arith.constant 0 : index
    %4 = vector.load %arg3[%c0_2, %c0_3] : memref<8x1xf32, #tpu.memory_space<vmem>>, vector<8x1xf32>
    %cst = arith.constant dense<0.000000e+00> : vector<8xf32>
    %5 = vector.multi_reduction <add>, %3, %cst [1] : vector<8x256xf32> to vector<8xf32>
    %6 = vector.shape_cast %5 : vector<8xf32> to vector<8x1xf32>
    %7 = arith.addf %4, %6 : vector<8x1xf32>
    %c0_4 = arith.constant 0 : index
    %c0_5 = arith.constant 0 : index
    %8 = vector.load %arg3[%c0_4, %c0_5] : memref<8x1xf32, #tpu.memory_space<vmem>>, vector<8x1xf32>
    tpu.vector_store %arg3[%c0_4, %c0_5], %7 {strides = array<i32>} : memref<8x1xf32, #tpu.memory_space<vmem>>, vector<8x1xf32>,
    return
  }
  func.func @transform_0(%arg0: i32, %arg1: i32) -> (i32, i32) {
    %c0_i32 = arith.constant 0 : i32
    return %arg0, %arg1 : i32, i32
  }
  func.func @transform_1(%arg0: i32, %arg1: i32) -> (i32, i32) {
    %c0_i32 = arith.constant 0 : i32
    %c0_i32_0 = arith.constant 0 : i32
    return %arg0, %c0_i32 : i32, i32
  }
}

</mosaic_0001>

<bundles_post_ra>
// kernel: tpu_custom_call.1
= control target key start
LH: loop header
LB: loop body
LE: loop exit
PB: predicated region body
PF: predicated region fallthrough
CT: control target
= control target key end

     0   :  { %6 = vsyncpa [#allocation3], 0  ;;  %s70_s9 = smov [#allocation2]   ;;  %s94_s0 = inlined_call_operand.hbm [shape: f32[8,256], index: 0, kind: input, shape index: {}]   ;;  %s95_s1 = inlined_call_operand.vmem [shape: f32[8,1], index: 1, kind: output, shape index: {}]  }
   0x1   :  { %s12_s8 = sshll.u32 %s94_s0, 4  ;;  %s14_s10 = sshll.u32 %s70_s9, 4  ;;  %s13_s8 = int_to_ptr.hbm [resolvable:$true] %s12_s8  ;;  %s15_s10 = int_to_ptr.vmem [resolvable:$true] %s14_s10 }
   0x2   :  { %17 = dma.hbm_to_vmem [thread:$0]  %s13_s8, 256, %s15_s10, [#allocation3]  }
   0x3   :  { %68 = dma.done.wait [#allocation3], 256  }
   0x4   :  { %69 = vsyncadd [#allocation3], 4294967040  ;;  %vm26_vm0 = vcmask 7168   ;;  %v71_v0 = vmov 0.0   ;;  %v28_v1 = vld [vmem:[#allocation2] sm:$0xff]  ;;  %v29_v2 = vld [vmem:[#allocation2 + $0x8] sm:$0xff] }
   0x5   :  { %27 = vst.msk [vmem:[%s95_s1] sm:$0xff] %vm26_vm0, %v71_v0  ;;  %v31_v3 = vadd.f32 %v29_v2, %v28_v1 }
   0x7   :  { %32 = vadd.xlane.f32.xlu0 %v31_v3 }
   0xc   :  { %v30_v4 = vld [vmem:[%s95_s1] sm:$0xff] }
  0x7a   :  { %v33_v5 = vpop.xlane.xlu0 %32 }
  0x7b   :  { %v34_v6 = vadd.f32 %v33_v5, %v30_v4 }
  0x7d   :  { %36 = vst.msk [vmem:[%s95_s1] sm:$0xff] %vm26_vm0, %v34_v6 }
  0x7e   :  { %41 = vsyncpa [#allocation3], 1 }

</bundles_post_ra>
